<compile_context>
chip_gen: v7x
topology: tpu7x:2x2x1
jax: 0.10.0
libtpu: 0.0.40
codegen_flags: <defaults>
</compile_context>

<pallas_src>
import math
from functools import partial

import jax
import jax.numpy as jnp
from jax import lax
from jax.experimental import pallas as pl
from jax.experimental.pallas import tpu as pltpu

EMBED_DIM = 64
LANE = 128


def _critic_cell_kernel(graph_ref, x_ref, wqkv_ref, mlp_ref, out_ref, *,
                        B, N, E, H1, H2,
                        off_b1, off_w2, off_b2, off_w3, off_b3):
    g = graph_ref[0]                      # (B, E)     graph embedding of this cell
    xn = x_ref[0]                         # (B*N, E)   node embeddings of this cell
    wqkv = wqkv_ref[...]                  # (E, 3*128) [Wq/sqrt(E)|pad|Wk|pad|Wv|pad]

    # --- Projections against the VMEM-resident fused weight.  The unused
    # cross-term columns are free (the MXU is essentially idle at this size),
    # and every slice below starts at a 128-lane tile boundary.
    node_proj = jnp.dot(xn, wqkv, preferred_element_type=jnp.float32)   # (B*N, 384)
    graph_proj = jnp.dot(g, wqkv, preferred_element_type=jnp.float32)   # (B,   384)

    q = graph_proj[:, 0:E]                        # (B, E), pre-scaled by 1/sqrt(E)
    k = node_proj[:, LANE:LANE + E]               # (B*N, E)
    v = node_proj[:, 2 * LANE:2 * LANE + E]       # (B*N, E)

    # --- Attention as block-diagonal-masked cross-attention (equivalent to a
    # per-batch softmax over the N nodes, but single non-batched matmuls).
    # q @ k^T with the transpose folded into the MXU operand latch (no k.T).
    logits = lax.dot_general(q, k, dimension_numbers=(((1,), (1,)), ((), ())),
                             preferred_element_type=jnp.float32)        # (B, B*N)
    row = lax.broadcasted_iota(jnp.int32, (B, B * N), 0)
    col = lax.broadcasted_iota(jnp.int32, (B, B * N), 1)
    mask = (col >= row * N) & (col < (row + 1) * N)
    logits = jnp.where(mask, logits, jnp.float32(-1e30))

    m = jnp.max(logits, axis=-1, keepdims=True)
    e = jnp.exp(logits - m)
    denom = jnp.sum(e, axis=-1, keepdims=True)
    # Exact reciprocal (denominator is only B values, approx buys nothing here).
    attn = e * pl.reciprocal(denom, approx=False)                       # (B, B*N)

    attended = jnp.dot(attn, v, preferred_element_type=jnp.float32)     # (B, E)

    # --- MLP head: Linear(E,128) -> tanh -> Dropout(0.5) -> Linear(128,256)
    #               -> tanh -> Linear(256,1)
    w1 = mlp_ref[0:E, 0:H1]                          # (E, 128)
    b1 = mlp_ref[off_b1:off_b1 + 1, 0:H1]            # (1, 128)
    h1 = jnp.tanh(jnp.dot(attended, w1, preferred_element_type=jnp.float32) + b1)
    # TODO(synk): Dropout(p=0.5) is identity here (inference / eval semantics).

    w2 = mlp_ref[off_w2:off_w2 + H1, 0:H2]           # (128, 256)
    b2 = mlp_ref[off_b2:off_b2 + 1, 0:H2]            # (1, 256)
    h2 = jnp.tanh(jnp.dot(h1, w2, preferred_element_type=jnp.float32) + b2)

    # Final Linear(256, 1): a 1-lane-output matmul wastes the MXU; VPU mul +
    # lane reduce instead.
    w3 = mlp_ref[off_w3:off_w3 + 1, 0:H2]            # (1, 256)
    b3 = mlp_ref[off_b3:off_b3 + 1, 0:1]             # (1, 1)
    value = jnp.sum(h2 * w3, axis=-1, keepdims=True) + b3               # (B, 1)

    out_ref[...] = value.reshape(1, B, 1).astype(out_ref.dtype)


def pack_params(params):
    """Pack 9 parameter arrays into 2 VMEM-resident kernel inputs.

    params = (wq, wk, wv, w1, b1, w2, b2, w3, b3); weights stored as
    (in_features, out_features), biases as (1, out_features)."""
    wq, wk, wv, w1, b1, w2, b2, w3, b3 = params
    E = wq.shape[0]
    H1 = w1.shape[1]
    H2 = w2.shape[1]

    # Fold 1/sqrt(embed_dim) into Wq; lane-tile-aligned packing at 0/128/256.
    inv_scale = 1.0 / math.sqrt(E)
    wqkv = jnp.zeros((E, 3 * LANE), jnp.float32)
    wqkv = wqkv.at[:, 0:E].set(wq * inv_scale)
    wqkv = wqkv.at[:, LANE:LANE + E].set(wk)
    wqkv = wqkv.at[:, 2 * LANE:2 * LANE + E].set(wv)

    def align8(n):
        return ((n + 7) // 8) * 8

    off_w1 = 0
    off_b1 = off_w1 + E
    off_w2 = align8(off_b1 + 1)
    off_b2 = off_w2 + H1
    off_w3 = align8(off_b2 + 1)
    off_b3 = align8(off_w3 + 1)
    total = align8(off_b3 + 1)
    width = max(H1, H2)

    blob = jnp.zeros((total, width), jnp.float32)
    blob = blob.at[off_w1:off_w1 + E, 0:H1].set(w1)
    blob = blob.at[off_b1, 0:H1].set(b1.reshape(H1))
    blob = blob.at[off_w2:off_w2 + H1, 0:H2].set(w2)
    blob = blob.at[off_b2, 0:H2].set(b2.reshape(H2))
    blob = blob.at[off_w3, 0:H2].set(w3.reshape(H2))
    blob = blob.at[off_b3, 0].set(b3.reshape(()))

    meta = dict(H1=H1, H2=H2, off_b1=off_b1, off_w2=off_w2,
                off_b2=off_b2, off_w3=off_w3, off_b3=off_b3)
    return wqkv, blob, meta


def critic_cell_forward_batched(graph_all, x_all, packed):
    """graph_all: (C, B, E), x_all: (C, B, N, E) -> (C, B, 1).

    One pallas_call: grid over the C cells, weights VMEM-resident across all
    grid steps, only activations stream."""
    wqkv, mlp_blob, meta = packed
    C, B, N, E = x_all.shape
    BN = B * N
    x2 = x_all.reshape(C, BN, E)          # free metadata reshape, no concat
    W = wqkv.shape[1]
    H1, H2 = meta["H1"], meta["H2"]

    # Advisory cost for XLA's scheduler.
    flops = C * (2 * BN * E * W + 2 * B * E * W + 4 * B * BN * E
                 + 2 * B * E * H1 + 2 * B * H1 * H2 + 2 * B * H2)
    transc = C * (B * BN + B * (H1 + H2))
    bytes_acc = 4 * (wqkv.size + mlp_blob.size + x2.size + graph_all.size + C * B)

    kernel = partial(_critic_cell_kernel, B=B, N=N, E=E, **meta)
    return pl.pallas_call(
        kernel,
        out_shape=jax.ShapeDtypeStruct((C, B, 1), jnp.float32),
        grid=(C,),
        in_specs=[
            pl.BlockSpec((1, B, E), lambda c: (c, 0, 0)),       # graph (streams)
            pl.BlockSpec((1, BN, E), lambda c: (c, 0, 0)),      # nodes (streams)
            pl.BlockSpec((E, W), lambda c: (0, 0)),             # wqkv (resident)
            pl.BlockSpec(mlp_blob.shape, lambda c: (0, 0)),     # mlp  (resident)
        ],
        out_specs=pl.BlockSpec((1, B, 1), lambda c: (c, 0, 0)),
        compiler_params=pltpu.CompilerParams(
            dimension_semantics=("parallel",)),                 # both TCs on v7x
        cost_estimate=pl.CostEstimate(flops=int(flops),
                                      transcendentals=int(transc),
                                      bytes_accessed=int(bytes_acc)),
    )(graph_all, x2, wqkv, mlp_blob)


def critic_cell_forward(graph, x, packed):
    """Single-cell convenience wrapper: graph (B,E), x (B,N,E) -> (B,1)."""
    return critic_cell_forward_batched(graph[None], x[None], packed)[0]


def init_params(key, embed_dim=EMBED_DIM):
    """Deterministic orthogonal init matching the module's __init__ shapes.

    Weights are stored as (in_features, out_features); biases are zeros."""
    ortho = jax.nn.initializers.orthogonal(scale=1.0)
    ks = jax.random.split(key, 6)
    # nn.Linear weight is (out, in); orthogonal init then transpose to (in, out).
    wq = ortho(ks[0], (embed_dim, embed_dim), jnp.float32).T
    wk = ortho(ks[1], (embed_dim, embed_dim), jnp.float32).T
    wv = ortho(ks[2], (embed_dim, embed_dim), jnp.float32).T
    w1 = ortho(ks[3], (128, embed_dim), jnp.float32).T              # (E, 128)
    b1 = jnp.zeros((1, 128), jnp.float32)
    w2 = ortho(ks[4], (256, 128), jnp.float32).T                    # (128, 256)
    b2 = jnp.zeros((1, 256), jnp.float32)
    w3 = ortho(ks[5], (1, 256), jnp.float32).T                      # (256, 1)
    b3 = jnp.zeros((1, 1), jnp.float32)
    return (wq, wk, wv, w1, b1, w2, b2, w3, b3)


if __name__ == "__main__":
    key = jax.random.PRNGKey(0)
    k_graph, k_x, k_params = jax.random.split(key, 3)

    C, B, N, E = 8, 2, 8, EMBED_DIM          # C independent cell evaluations
    graph_all = jax.random.normal(k_graph, (C, B, E), dtype=jnp.float32)
    x_all = jax.random.normal(k_x, (C, B, N, E), dtype=jnp.float32)
    params = init_params(k_params, E)
    packed = pack_params(params)

    values = critic_cell_forward_batched(graph_all, x_all, packed)
    jax.block_until_ready(values)
    assert values.shape == (C, B, 1), values.shape

    # Pure-JAX reference check (batched over the C cells).
    wq, wk, wv, w1, b1, w2, b2, w3, b3 = params
    q = jnp.einsum('cbe,ef->cbf', graph_all, wq)
    kk = jnp.einsum('cbne,ef->cbnf', x_all, wk)
    vv = jnp.einsum('cbne,ef->cbnf', x_all, wv)
    logits = jnp.einsum('cbe,cbne->cbn', q, kk) / math.sqrt(E)
    attn = jax.nn.softmax(logits, axis=-1)
    att = jnp.einsum('cbn,cbne->cbe', attn, vv)
    h1 = jnp.tanh(att @ w1 + b1)
    h2 = jnp.tanh(h1 @ w2 + b2)
    ref = h2 @ w3 + b3                                              # (C, B, 1)
    assert jnp.allclose(values, ref, atol=1e-3, rtol=1e-3), (values, ref)

    # Single-cell path (module-parity entry point) against the same reference.
    v0 = critic_cell_forward(graph_all[0], x_all[0], packed)
    jax.block_until_ready(v0)
    assert v0.shape == (B, 1), v0.shape
    assert jnp.allclose(v0, ref[0], atol=1e-3, rtol=1e-3), (v0, ref[0])

    print("KERNEL_OK")
</pallas_src>

<mosaic_0001>
module attributes {stable_mosaic.version = 11 : i64} {
  func.func @_critic_cell_kernel(%arg0: i32, %arg1: memref<1x2x64xf32, #tpu.memory_space<vmem>>, %arg2: memref<1x16x64xf32, #tpu.memory_space<vmem>>, %arg3: memref<64x384xf32, #tpu.memory_space<vmem>>, %arg4: memref<224x256xf32, #tpu.memory_space<vmem>>, %arg5: memref<1x2x1xf32, #tpu.memory_space<vmem>>) attributes {dimension_semantics = [#tpu.dimension_semantics<parallel>], iteration_bounds = array<i64: 8>, scalar_prefetch = 0 : i64, scratch_operands = 0 : i64, tpu.core_type = #tpu.core_type<tc>, window_params = [{transform_indices = @transform_0, window_bounds = array<i64: 1, 2, 64>}, {transform_indices = @transform_1, window_bounds = array<i64: 1, 16, 64>}, {pipeline_mode = #tpu.pipeline_mode<synchronous>, transform_indices = @transform_2, window_bounds = array<i64: 64, 384>}, {pipeline_mode = #tpu.pipeline_mode<synchronous>, transform_indices = @transform_3, window_bounds = array<i64: 224, 256>}, {transform_indices = @transform_4, window_bounds = array<i64: 1, 2, 1>}]} {
    %c0 = arith.constant 0 : index
    %c0_0 = arith.constant 0 : index
    %c0_1 = arith.constant 0 : index
    %0 = vector.load %arg1[%c0, %c0_0, %c0_1] : memref<1x2x64xf32, #tpu.memory_space<vmem>>, vector<1x2x64xf32>
    %1 = vector.shape_cast %0 : vector<1x2x64xf32> to vector<2x64xf32>
    %c0_2 = arith.constant 0 : index
    %c0_3 = arith.constant 0 : index
    %c0_4 = arith.constant 0 : index
    %2 = vector.load %arg2[%c0_2, %c0_3, %c0_4] : memref<1x16x64xf32, #tpu.memory_space<vmem>>, vector<1x16x64xf32>
    %3 = vector.shape_cast %2 : vector<1x16x64xf32> to vector<16x64xf32>
    %c0_5 = arith.constant 0 : index
    %c0_6 = arith.constant 0 : index
    %4 = vector.load %arg3[%c0_5, %c0_6] : memref<64x384xf32, #tpu.memory_space<vmem>>, vector<64x384xf32>
    %cst = arith.constant dense<0.000000e+00> : vector<16x384xf32>
    %5 = tpu.matmul %3, %4, %cst {dimension_numbers = #tpu.dot_dimension_numbers<[1], [0], [0], [1], [0, 0, 1, 1], [], []>} : vector<16x64xf32>, vector<64x384xf32>, vector<16x384xf32> -> vector<16x384xf32>
    %cst_7 = arith.constant dense<0.000000e+00> : vector<2x384xf32>
    %6 = tpu.matmul %1, %4, %cst_7 {dimension_numbers = #tpu.dot_dimension_numbers<[1], [0], [0], [1], [0, 0, 1, 1], [], []>} : vector<2x64xf32>, vector<64x384xf32>, vector<2x384xf32> -> vector<2x384xf32>
    %7 = vector.extract_strided_slice %6 {offsets = [0, 0], sizes = [2, 64], strides = [1, 1]} : vector<2x384xf32> to vector<2x64xf32>
    %8 = vector.extract_strided_slice %5 {offsets = [0, 128], sizes = [16, 64], strides = [1, 1]} : vector<16x384xf32> to vector<16x64xf32>
    %9 = vector.extract_strided_slice %5 {offsets = [0, 256], sizes = [16, 64], strides = [1, 1]} : vector<16x384xf32> to vector<16x64xf32>
    %cst_8 = arith.constant dense<0.000000e+00> : vector<2x16xf32>
    %10 = tpu.matmul %7, %8, %cst_8 {dimension_numbers = #tpu.dot_dimension_numbers<[1], [1], [0], [0], [0, 0, 1, 0], [], []>} : vector<2x64xf32>, vector<16x64xf32>, vector<2x16xf32> -> vector<2x16xf32>
    %11 = tpu.iota {dimensions = array<i32: 0>} : vector<2x16xi32>
    %12 = tpu.iota {dimensions = array<i32: 1>} : vector<2x16xi32>
    %c8_i32 = arith.constant 8 : i32
    %13 = vector.broadcast %c8_i32 : i32 to vector<2x16xi32>
    %14 = arith.muli %11, %13 : vector<2x16xi32>
    %15 = arith.cmpi sge, %12, %14 : vector<2x16xi32>
    %c1_i32 = arith.constant 1 : i32
    %16 = vector.broadcast %c1_i32 : i32 to vector<2x16xi32>
    %17 = arith.addi %11, %16 : vector<2x16xi32>
    %c8_i32_9 = arith.constant 8 : i32
    %18 = vector.broadcast %c8_i32_9 : i32 to vector<2x16xi32>
    %19 = arith.muli %17, %18 : vector<2x16xi32>
    %20 = arith.cmpi slt, %12, %19 : vector<2x16xi32>
    %21 = arith.andi %15, %20 : vector<2x16xi1>
    %cst_10 = arith.constant -1.000000e+30 : f32
    %22 = vector.broadcast %cst_10 : f32 to vector<2x16xf32>
    %23 = arith.select %21, %10, %22 : vector<2x16xi1>, vector<2x16xf32>
    %cst_11 = arith.constant dense<0xFF800000> : vector<2xf32>
    %24 = vector.multi_reduction <maximumf>, %23, %cst_11 [1] : vector<2x16xf32> to vector<2xf32>
    %25 = vector.shape_cast %24 : vector<2xf32> to vector<2x1xf32>
    %26 = vector.broadcast %25 : vector<2x1xf32> to vector<2x16xf32>
    %27 = arith.subf %23, %26 : vector<2x16xf32>
    %28 = math.exp %27 : vector<2x16xf32>
    %cst_12 = arith.constant dense<0.000000e+00> : vector<2xf32>
    %29 = vector.multi_reduction <add>, %28, %cst_12 [1] : vector<2x16xf32> to vector<2xf32>
    %30 = vector.shape_cast %29 : vector<2xf32> to vector<2x1xf32>
    %31 = tpu.reciprocal %30 : vector<2x1xf32> -> vector<2x1xf32>
    %32 = vector.broadcast %31 : vector<2x1xf32> to vector<2x16xf32>
    %33 = arith.mulf %28, %32 : vector<2x16xf32>
    %cst_13 = arith.constant dense<0.000000e+00> : vector<2x64xf32>
    %34 = tpu.matmul %33, %9, %cst_13 {dimension_numbers = #tpu.dot_dimension_numbers<[1], [0], [0], [1], [0, 0, 1, 1], [], []>} : vector<2x16xf32>, vector<16x64xf32>, vector<2x64xf32> -> vector<2x64xf32>
    %c0_14 = arith.constant 0 : index
    %c0_15 = arith.constant 0 : index
    %35 = vector.load %arg4[%c0_14, %c0_15] : memref<224x256xf32, #tpu.memory_space<vmem>>, vector<64x128xf32>
    %c64 = arith.constant 64 : index
    %c0_16 = arith.constant 0 : index
    %36 = vector.load %arg4[%c64, %c0_16] : memref<224x256xf32, #tpu.memory_space<vmem>>, vector<1x128xf32>
    %cst_17 = arith.constant dense<0.000000e+00> : vector<2x128xf32>
    %37 = tpu.matmul %34, %35, %cst_17 {dimension_numbers = #tpu.dot_dimension_numbers<[1], [0], [0], [1], [0, 0, 1, 1], [], []>} : vector<2x64xf32>, vector<64x128xf32>, vector<2x128xf32> -> vector<2x128xf32>
    %38 = vector.broadcast %36 : vector<1x128xf32> to vector<2x128xf32>
    %39 = arith.addf %37, %38 : vector<2x128xf32>
    %40 = math.tanh %39 : vector<2x128xf32>
    %c72 = arith.constant 72 : index
    %c0_18 = arith.constant 0 : index
    %41 = vector.load %arg4[%c72, %c0_18] : memref<224x256xf32, #tpu.memory_space<vmem>>, vector<128x256xf32>
    %c200 = arith.constant 200 : index
    %c0_19 = arith.constant 0 : index
    %42 = vector.load %arg4[%c200, %c0_19] : memref<224x256xf32, #tpu.memory_space<vmem>>, vector<1x256xf32>
    %cst_20 = arith.constant dense<0.000000e+00> : vector<2x256xf32>
    %43 = tpu.matmul %40, %41, %cst_20 {dimension_numbers = #tpu.dot_dimension_numbers<[1], [0], [0], [1], [0, 0, 1, 1], [], []>} : vector<2x128xf32>, vector<128x256xf32>, vector<2x256xf32> -> vector<2x256xf32>
    %44 = vector.broadcast %42 : vector<1x256xf32> to vector<2x256xf32>
    %45 = arith.addf %43, %44 : vector<2x256xf32>
    %46 = math.tanh %45 : vector<2x256xf32>
    %c208 = arith.constant 208 : index
    %c0_21 = arith.constant 0 : index
    %47 = vector.load %arg4[%c208, %c0_21] : memref<224x256xf32, #tpu.memory_space<vmem>>, vector<1x256xf32>
    %c216 = arith.constant 216 : index
    %c0_22 = arith.constant 0 : index
    %48 = vector.load %arg4[%c216, %c0_22] : memref<224x256xf32, #tpu.memory_space<vmem>>, vector<1x1xf32>
    %49 = vector.broadcast %47 : vector<1x256xf32> to vector<2x256xf32>
    %50 = arith.mulf %46, %49 : vector<2x256xf32>
    %cst_23 = arith.constant dense<0.000000e+00> : vector<2xf32>
    %51 = vector.multi_reduction <add>, %50, %cst_23 [1] : vector<2x256xf32> to vector<2xf32>
    %52 = vector.shape_cast %51 : vector<2xf32> to vector<2x1xf32>
    %53 = vector.broadcast %48 : vector<1x1xf32> to vector<2x1xf32>
    %54 = arith.addf %52, %53 : vector<2x1xf32>
    %55 = vector.shape_cast %54 : vector<2x1xf32> to vector<1x2x1xf32>
    %c0_24 = arith.constant 0 : index
    %c0_25 = arith.constant 0 : index
    %c0_26 = arith.constant 0 : index
    %56 = vector.load %arg5[%c0_24, %c0_25, %c0_26] : memref<1x2x1xf32, #tpu.memory_space<vmem>>, vector<1x2x1xf32>
    tpu.vector_store %arg5[%c0_24, %c0_25, %c0_26], %55 {strides = array<i32>} : memref<1x2x1xf32, #tpu.memory_space<vmem>>, vector<1x2x1xf32>,
    return
  }
  func.func @transform_0(%arg0: i32) -> (i32, i32, i32) {
    %c0_i32 = arith.constant 0 : i32
    %c0_i32_0 = arith.constant 0 : i32
    %c0_i32_1 = arith.constant 0 : i32
    return %arg0, %c0_i32, %c0_i32_0 : i32, i32, i32
  }
  func.func @transform_1(%arg0: i32) -> (i32, i32, i32) {
    %c0_i32 = arith.constant 0 : i32
    %c0_i32_0 = arith.constant 0 : i32
    %c0_i32_1 = arith.constant 0 : i32
    return %arg0, %c0_i32, %c0_i32_0 : i32, i32, i32
  }
  func.func @transform_2(%arg0: i32) -> (i32, i32) {
    %c0_i32 = arith.constant 0 : i32
    %c0_i32_0 = arith.constant 0 : i32
    %c0_i32_1 = arith.constant 0 : i32
    return %c0_i32, %c0_i32_0 : i32, i32
  }
  func.func @transform_3(%arg0: i32) -> (i32, i32) {
    %c0_i32 = arith.constant 0 : i32
    %c0_i32_0 = arith.constant 0 : i32
    %c0_i32_1 = arith.constant 0 : i32
    return %c0_i32, %c0_i32_0 : i32, i32
  }
  func.func @transform_4(%arg0: i32) -> (i32, i32, i32) {
    %c0_i32 = arith.constant 0 : i32
    %c0_i32_0 = arith.constant 0 : i32
    %c0_i32_1 = arith.constant 0 : i32
    return %arg0, %c0_i32, %c0_i32_0 : i32, i32, i32
  }
}

</mosaic_0001>

<bundles_post_ra>
// kernel: tpu_custom_call.1
= control target key start
LH: loop header
LB: loop body
LE: loop exit
PB: predicated region body
PF: predicated region fallthrough
CT: control target
= control target key end

     0   :  { %9 = vsyncpa [#allocation3], 0  ;;  %s1800_s0 = inlined_call_operand.hbm [shape: f32[8,2,64], index: 0, kind: input, shape index: {}]   ;;  %s1801_s1 = inlined_call_operand.hbm [shape: f32[8,16,64], index: 1, kind: input, shape index: {}]   ;;  %s1802_s2 = inlined_call_operand.hbm [shape: f32[64,384], index: 2, kind: input, shape index: {}]   ;;  %s1803_s3 = inlined_call_operand.hbm [shape: f32[224,256], index: 3, kind: input, shape index: {}]   ;;  %s1804_s4 = inlined_call_operand.vmem [shape: f32[8,2,1], index: 4, kind: output, shape index: {}]  }
   0x1   :  { %11 = vsyncpa [#allocation3 + $0x1], 0 }
   0x2   :  { %12 = vsyncpa [#allocation5], 0 }
   0x3   :  { %14 = vsyncpa [#allocation5 + $0x1], 0 }
   0x4   :  { %15 = vsyncpa [#allocation8], 0  ;;  %s1539_s15 = smov 0   ;;  %s1541_s16 = smov 0  }
   0x5   :  { %s1543_s17 = smov 0   ;;  %s1545_s18 = smov 0  }
   0x6 LB: > { %s1558_s19 = sadd.s32 4294967295, %s1499_s18   ;;  %p41_p0 = scmp.ne.s32.totalorder %s1491_s16, %s1487_s15  ;;  %s1499_s18 = sphi %s1545_s18, %s1821_s18   ;;  %s1495_s17 = sphi %s1543_s17, %s1820_s17   ;;  %s1491_s16 = sphi %s1541_s16, %s1819_s16   ;;  %s1487_s15 = sphi %s1539_s15, %s1818_s15  }
   0x7   : > { %p1805_p1 = scmp.eq.s32.totalorder %s1558_s19, 0  ;;  %p1049_p2 = scmp.ge.s32.totalorder %s1499_s18, 1 }
   0x8   : > { %p146_p3 = scmp.lt.s32.totalorder %s1499_s18, 9  ;;  %s1501_s22 = smov [#allocation6]  }
   0x9   : > { %p1566_p4 = por %p1805_p1, %p41_p0  ;;  %s158_s23 = sshll.u32 %s1501_s22, 4  ;;  %s159_s23 = int_to_ptr.vmem [resolvable:$true] %s158_s23 }
   0xa   : > { %p1570_p5 = pnand %p1049_p2, %p146_p3  ;;  %s1502_s25 = smov [#allocation7]  }
   0xb   : > { %s1808_s20 = scalar_select %p1566_p4, 1, 0 }
   0xc   : > { %s1809_s21 = scalar_select %p1570_p5, 1, 0 }
   0xd   : > { %p1265_p6 = pneg %p1570_p5  ;;  %s171_s26 = sshll.u32 %s1502_s25, 4  ;;  %s1582_s26 = int_to_ptr.vmem [resolvable:$true] %s171_s26 }
   0xe   : > { %s1337_s29 = scalar_lea.hbm %s1802_s2, 3072 }
   0xf   : > { %p1578_p7 = pnand %p1265_p6, %p1805_p1  ;;  %p1338_p8 = scmp.ne.s32.totalorder %s1802_s2, %s1337_s29 }
  0x10   : > { %p1344_p12 = scmp.lt.u32.totalorder %s1337_s29, %s1802_s2 }
  0x11   : > { %p1339_p9 = pneg %p1578_p7 }
  0x13   : > { %p1340_p10 = pnand %p1339_p9, %p1338_p8 }
  0x15   : > { %p1341_p11 = pneg %p1340_p10 }
  0x17   : > { %p1346_p13 = pnand %p1344_p12, %p1341_p11 }
  0x19   : > { %1349 = shalt.err (!%p1346_p13)
}
  0x1a   : > { %s1350_s8 = scalar_lea.vmem %s159_s23, 3072  ;;  %p1358_p6 = scmp.lt.s32.totalorder %s159_s23, %s159_s23 }
  0x1b   : > { %p1351_p0 = scmp.ne.s32.totalorder %s159_s23, %s1350_s8  ;;  %p1359_p1 = scmp.lt.s32.totalorder %s1350_s8, %s1350_s8 }
  0x1d   : > { %p1353_p2 = pnand %p1351_p0, %p1339_p9  ;;  %p1360_p4 = por %p1359_p1, %p1358_p6 }
  0x1f   : > { %p1354_p3 = pneg %p1353_p2 }
  0x21   : > { %p1361_p5 = pnand %p1360_p4, %p1354_p3 }
  0x23   : > { %1364 = shalt.err (!%p1361_p5)
}
  0x24   : > { %s1503_s9 = smov 384   ;;  %s1504_s10 = smov 24  }
  0x25   : > { %1268 = dma.hbm_to_vmem [thread:$0]  (!%p1578_p7), %s1802_s2, 3072, %s159_s23, [#allocation5], %s1503_s9, %s1503_s9, %s1504_s10  }
  0x26   : > { %s1365_s15 = scalar_lea.hbm %s1803_s3, 7168 }
  0x27   : > { %p1366_p8 = scmp.ne.s32.totalorder %s1803_s3, %s1365_s15  ;;  %p1372_p5 = scmp.lt.u32.totalorder %s1365_s15, %s1803_s3 }
  0x29   : > { %p1368_p1 = pnand %p1366_p8, %p1339_p9 }
  0x2b   : > { %p1369_p4 = pneg %p1368_p1 }
  0x2d   : > { %p1374_p10 = pnand %p1372_p5, %p1369_p4 }
  0x2f   : > { %1377 = shalt.err (!%p1374_p10)
}
  0x30   : > { %s1378_s23 = scalar_lea.vmem %s1582_s26, 7168  ;;  %p1386_p0 = scmp.lt.s32.totalorder %s1582_s26, %s1582_s26 }
  0x31   : > { %p1379_p11 = scmp.ne.s32.totalorder %s1582_s26, %s1378_s23  ;;  %p1387_p2 = scmp.lt.s32.totalorder %s1378_s23, %s1378_s23 }
  0x33   : > { %p1381_p12 = pnand %p1379_p11, %p1339_p9  ;;  %p1388_p3 = por %p1387_p2, %p1386_p0 }
  0x35   : > { %p1382_p13 = pneg %p1381_p12 }
  0x37   : > { %p1389_p6 = pnand %p1388_p3, %p1382_p13 }
  0x39   : > { %1392 = shalt.err (!%p1389_p6)
}
  0x3a   : > { %s1505_s29 = smov 256   ;;  %s1506_s30 = smov 16  }
  0x3b   : > { %1271 = dma.hbm_to_vmem [thread:$0]  (!%p1578_p7), %s1803_s3, 7168, %s1582_s26, [#allocation8], %s1505_s29, %s1505_s29, %s1506_s30  }
  0x3c   : > { %s1632_s7 = sadd.s32 1, %s1499_s18   ;;  %s28_s9 = sadd.s32 1, %s1495_s17 }
  0x3d   : > { %s25_s8 = ssub.s32 %s1499_s18, %s1632_s7  ;;  %p35_p8 = scmp.ne.s32.totalorder %s1495_s17, %s1491_s16 }
  0x3e   : > { %p26_p9 = scmp.eq.s32.totalorder %s25_s8, 0  ;;  %p36_p1 = scmp.eq.s32.totalorder %s1499_s18, 0 }
  0x3f   : > { %p1281_p5 = scmp.lt.s32.totalorder %s1499_s18, 8  ;;  %s1645_s11 = sand.u32 1, %s1495_s17  }
  0x40   : > { %s1641_s10 = scalar_select %p26_p9, %s1495_s17, %s28_s9  }
  0x41   : > { %p37_p4 = por %p36_p1, %p35_p8  ;;  %s1054_s24 = sshll.u32 %s1499_s18, 5 }
  0x42   : > { %s1053_s12 = sshll.u32 %s1645_s11, 1  ;;  %s1652_s14 = scalar_lea.hbm %s1800_s0, %s1054_s24 }
  0x43   : > { %s189_s15 = scalar_lea.vmem [#allocation2], %s1053_s12  ;;  %p1654_p7 = pnand %p1281_p5, %p37_p4 }
  0x44   : > { %s196_s22 = sshll.u32 %s189_s15, 4  ;;  %s1055_s27 = sshll.u32 %s1645_s11, 4  ;;  %s1658_s22 = int_to_ptr.vmem [resolvable:$true] %s196_s22 }
  0x45   : > { %s186_s28 = scalar_lea.sflag [#allocation3], %s1645_s11  ;;  %s1393_s23 = scalar_lea.hbm %s1652_s14, 32 }
  0x46   : > { %p1394_p10 = scmp.ne.s32.totalorder %s1652_s14, %s1393_s23  ;;  %p1395_p11 = pneg %p1654_p7 }
  0x47   : > { %s1398_s5 = scalar_lea.hbm %s1800_s0, 256  ;;  %p1399_p0 = scmp.lt.u32.totalorder %s1652_s14, %s1800_s0 }
  0x48   : > { %p1396_p12 = pnand %p1395_p11, %p1394_p10  ;;  %p1400_p2 = scmp.lt.u32.totalorder %s1398_s5, %s1393_s23 }
  0x49   : > { %p1402_p6 = scmp.lt.u32.totalorder %s1393_s23, %s1652_s14 }
  0x4a   : > { %p1397_p13 = pneg %p1396_p12  ;;  %p1401_p3 = por %p1400_p2, %p1399_p0 }
  0x4c   : > { %p1403_p9 = por %p1402_p6, %p1401_p3 }
  0x4e   : > { %p1404_p8 = pnand %p1403_p9, %p1397_p13 }
  0x50   : > { %1407 = shalt.err (!%p1404_p8)
}
  0x51   : > { %s1408_s9 = scalar_lea.vmem %s1658_s22, 32  ;;  %s1507_s24 = smov [#allocation2]  }
  0x52   : > { %p1409_p1 = scmp.ne.s32.totalorder %s1658_s22, %s1408_s9  ;;  %s1413_s12 = sshll.u32 %s1507_s24, 4  ;;  %s1414_s12 = int_to_ptr.vmem [resolvable:$false] %s1413_s12 }
  0x53   : > { %s1415_s26 = scalar_lea.vmem %s1414_s12, 64  ;;  %p1416_p10 = scmp.lt.s32.totalorder %s1658_s22, %s1414_s12 }
  0x54   : > { %p1411_p4 = pnand %p1409_p1, %p1395_p11  ;;  %p1417_p12 = scmp.lt.s32.totalorder %s1415_s26, %s1408_s9 }
  0x56   : > { %p1412_p5 = pneg %p1411_p4  ;;  %p1418_p0 = por %p1417_p12, %p1416_p10 }
  0x58   : > { %p1419_p2 = pnand %p1418_p0, %p1412_p5 }
  0x5a   : > { %1422 = shalt.err (!%p1419_p2)
}
  0x5b   : > { %1275 = dma.hbm_to_vmem [thread:$0]  (!%p1654_p7), %s1652_s14, 32, %s1658_s22, %s186_s28  }
  0x5c   : > { %s207_s13 = scalar_lea.vmem [#allocation4], %s1055_s27  ;;  %s203_s23 = sand.u32 1, %s1499_s18  }
  0x5d   : > { %s214_s15 = sshll.u32 %s207_s13, 4  ;;  %s1076_s29 = sshll.u32 %s1499_s18, 8  ;;  %s1690_s15 = int_to_ptr.vmem [resolvable:$true] %s214_s15 }
  0x5e   : > { %s1696_s6 = scalar_lea.hbm %s1801_s1, %s1076_s29  ;;  %s1698_s8 = scalar_lea.sflag [#allocation5], %s203_s23 }
  0x5f   : > { %s1423_s9 = scalar_lea.hbm %s1696_s6, 256  ;;  %s1428_s18 = scalar_lea.hbm %s1801_s1, 2048 }
  0x60   : > { %p1424_p13 = scmp.ne.s32.totalorder %s1696_s6, %s1423_s9  ;;  %p1429_p9 = scmp.lt.u32.totalorder %s1696_s6, %s1801_s1 }
  0x61   : > { %p1430_p8 = scmp.lt.u32.totalorder %s1428_s18, %s1423_s9  ;;  %p1432_p4 = scmp.lt.u32.totalorder %s1423_s9, %s1696_s6 }
  0x62   : > { %p1426_p3 = pnand %p1424_p13, %p1395_p11 }
  0x63   : > { %p1431_p1 = por %p1430_p8, %p1429_p9 }
  0x64   : > { %p1427_p6 = pneg %p1426_p3 }
  0x65   : > { %p1433_p5 = por %p1432_p4, %p1431_p1 }
  0x67   : > { %p1434_p10 = pnand %p1433_p5, %p1427_p6 }
  0x69   : > { %1437 = shalt.err (!%p1434_p10)
}
  0x6a   : > { %s1438_s28 = scalar_lea.vmem %s1690_s15, 256  ;;  %s1508_s24 = smov [#allocation4]  }
  0x6b   : > { %p1439_p12 = scmp.ne.s32.totalorder %s1690_s15, %s1438_s28  ;;  %s1443_s12 = sshll.u32 %s1508_s24, 4  ;;  %s1444_s12 = int_to_ptr.vmem [resolvable:$false] %s1443_s12 }
  0x6c   : > { %s1445_s26 = scalar_lea.vmem %s1444_s12, 512  ;;  %p1446_p13 = scmp.lt.s32.totalorder %s1690_s15, %s1444_s12 }
  0x6d   : > { %p1441_p0 = pnand %p1439_p12, %p1395_p11  ;;  %p1447_p3 = scmp.lt.s32.totalorder %s1445_s26, %s1438_s28 }
  0x6f   : > { %p1442_p2 = pneg %p1441_p0  ;;  %p1448_p9 = por %p1447_p3, %p1446_p13 }
  0x71   : > { %p1449_p8 = pnand %p1448_p9, %p1442_p2 }
  0x73   : > { %1452 = shalt.err (!%p1449_p8)
}
  0x74   : > { %s1509_s13 = smov 128   ;;  %s1510_s23 = smov 8  }
  0x75   : > { %1278 = dma.hbm_to_vmem [thread:$0]  (!%p1654_p7), %s1696_s6, 256, %s1690_s15, %s1698_s8, %s1509_s13, %s1509_s13, %s1510_s23  }
  0x76   : > { %p1812_p11 = scmp.ne.s32.totalorder %s1809_s21, 0 }
  0x77   : > { %s228_s29 = sand.u32 (!%p1812_p11), 1, %s1491_s16   ;;  %p1813_p6 = scmp.ne.s32.totalorder (!%p1812_p11), %s1808_s20, 0 }
  0x78   : > { %226 = sbr.rel (%p1812_p11) target bundleno = 1723 (0x6bb), region = 36  ;;  %s1059_s30 = sshll.u32 (!%p1812_p11), %s228_s29, 1 }
  0x79   : > { %s229_s5 = scalar_lea.sflag (!%p1812_p11), [#allocation3], %s228_s29  ;;  %s1727_s9 = scalar_lea.vmem (!%p1812_p11), [#allocation2], %s1059_s30 }
  0x7f   : > { %1470 = dma.done.wait (%p1813_p6), %s229_s5, 32  }
  0x80   : > { %1472 = vsyncadd (%p1813_p6), %s229_s5, 4294967264  ;;  %s237_s11 = sand.u32 1, %s1558_s19   ;;  %s1060_s25 = sshll.u32 %s228_s29, 4 }
  0x81   : > { %s238_s15 = scalar_lea.sflag [#allocation5], %s237_s11  ;;  %s1734_s6 = scalar_lea.vmem [#allocation4], %s1060_s25 }
  0x82   : > { %1474 = dma.done.wait (%p1813_p6), %s238_s15, 256  }
  0x83   : > { %1476 = vsyncadd (%p1813_p6), %s238_s15, 4294967040  ;;  %p1814_p7 = scmp.eq.s32.totalorder %s1558_s19, 0 }
  0x85   : > { %1478 = dma.done.wait (%p1814_p7), [#allocation5], 3072   ;;  %p1815_p1 = pmov %p1814_p7 }
  0x87   : > { %1480 = vsyncadd (%p1815_p1), [#allocation5], 4294964224  ;;  %p1816_p4 = pmov %p1815_p1 }
  0x88   : > { %p1817_p5 = pmov %p1815_p1 }
  0x89   : > { %1482 = dma.done.wait (%p1816_p4), [#allocation8], 7168  }
  0x8a   : > { %1484 = vsyncadd (%p1817_p5), [#allocation8], 4294960128  ;;  %v1511_v0 = vmov 0.0   ;;  %v286_v1 = vld [vmem:[#allocation6 + $0x8] sm:$0xff]  ;;  %v289_v2 = vld [vmem:[#allocation6 + $0x20] sm:$0xff]  ;;  %vm309_vm0 = vcmask 523264   ;;  %v618_v48 = vlaneseq }
  0x8b   : > { %380 = vmatprep.mubr.f32.mxu1 %v1511_v0  ;;  %533 = vmatprep.mubr.f32.mxu0 %v1511_v0  ;;  %v285_v3 = vld [vmem:[#allocation6] sm:$0xff]  ;;  %v1154_v4 = vpack.c.bf16 %v289_v2, %v286_v1  ;;  %v288_v5 = vld [vmem:[#allocation6 + $0x18] sm:$0xff]  ;;  %v295_v7 = vld [vmem:[#allocation6 + $0x50] sm:$0xff]  ;;  %v1512_v28 = vmov 0.0|0.0   ;;  %vm1513_vm1 = vmmov 0   ;;  %vm629_vm6 = vcmask 123904  }
  0x8c   : > { %v292_v6 = vld [vmem:[#allocation6 + $0x38] sm:$0xff]  ;;  %v1156_v8 = vpack.c.bf16 %v288_v5, %v285_v3  ;;  %v291_v10 = vld [vmem:[#allocation6 + $0x30] sm:$0xff]  ;;  %v294_v11 = vld [vmem:[#allocation6 + $0x48] sm:$0xff]  ;;  %v1769_v49 = vshrl.u32 %v618_v48, 7  ;;  %v621_v51 = vand.u32 127, %v618_v48  ;;  %vm641_vm7 = vcmask 130048  }
  0x8d   : > { %v1158_v9 = vpack.c.bf16 %v295_v7, %v292_v6  ;;  %v298_v12 = vld [vmem:[#allocation6 + $0x68] sm:$0xff]  ;;  %1155 = vmatprep.subr.bf16.mxu1 %v1154_v4  ;;  %v301_v13 = vld [vmem:[#allocation6 + $0x80] sm:$0xff]  ;;  %1187 = vmatprep.subr.bf16.mxu0 %v1154_v4  ;;  %v1160_v14 = vpack.c.bf16 %v294_v11, %v291_v10  ;;  %v300_v17 = vld [vmem:[#allocation6 + $0x78] sm:$0xff]  ;;  %vm932_vm8 = vcmask 1041408   ;;  %p278_p10 = scmp.lt.s32.totalorder %s1558_s19, 7  ;;  %vm939_vm9 = vcmask 1024  }
  0x8e   : > { %1157 = vmatpush1.bf16.msra.mxu1 %v1156_v8  ;;  %1189 = vmatpush1.bf16.msra.mxu0 %v1156_v8  ;;  %v1162_v15 = vpack.c.bf16 %v301_v13, %v298_v12  ;;  %v297_v16 = vld [vmem:[#allocation6 + $0x60] sm:$0xff]  ;;  %v304_v18 = vld [vmem:[#allocation6 + $0x98] sm:$0xff]  ;;  %v307_v19 = vld [vmem:[#allocation6 + $0xb0] sm:$0xff]  ;;  %v624_v50 = vadd.s32 1, %v1769_v49  ;;  %v622_v52 = vmul.u32 8, %v1769_v49 }
  0x8f   : > { %1159 = vmatprep.subr.bf16.mxu1 %v1158_v9  ;;  %1191 = vmatprep.subr.bf16.mxu0 %v1158_v9  ;;  %v1164_v20 = vpack.c.bf16 %v300_v17, %v297_v16  ;;  %v1166_v21 = vpack.c.bf16 %v307_v19, %v304_v18  ;;  %v303_v22 = vld [vmem:[#allocation6 + $0x90] sm:$0xff]  ;;  %v306_v23 = vld [vmem:[#allocation6 + $0xa8] sm:$0xff]  ;;  %v282_v26 = vld [vmem:[%s1727_s9] sm:$0x3]  ;;  %s1823_s19 = smov (!%p278_p10, %s1558_s19), 7 }
  0x90   : > { %v1168_v24 = vpack.c.bf16 %v306_v23, %v303_v22  ;;  %v283_v25 = vld [vmem:[%s1734_s6] sm:$0xff]  ;;  %v284_v27 = vld [vmem:[%s1734_s6 + $0x8] sm:$0xff]  ;;  %vm1204_vm2 = vmpackc.low %vm309_vm0, %vm309_vm0  ;;  %v625_v53 = vmul.u32 8, %v624_v50  ;;  %vm623_vm3 = vcmp.ge.s32.totalorder %v621_v51, %v622_v52  ;;  %s1063_s20 = sshll.u32 %s1823_s19, 1 }
  0x91   : > { %v287_v36 = vld [vmem:[#allocation6 + $0x10] sm:$0xff]  ;;  %v290_v37 = vld [vmem:[#allocation6 + $0x28] sm:$0xff]  ;;  %v293_v38 = vld [vmem:[#allocation6 + $0x40] sm:$0xff]  ;;  %s281_s14 = scalar_lea.vmem %s1804_s4, %s1063_s20 }
  0x92   : > { %1161 = vmatpush1.bf16.msra.mxu1 %v1160_v14  ;;  %1193 = vmatpush1.bf16.msra.mxu0 %v1160_v14  ;;  %v1170_v39 = vpack.c.bf16 %v290_v37, %v287_v36  ;;  %v296_v40 = vld [vmem:[#allocation6 + $0x58] sm:$0xff]  ;;  %v299_v42 = vld [vmem:[#allocation6 + $0x70] sm:$0xff]  ;;  %v302_v43 = vld [vmem:[#allocation6 + $0x88] sm:$0xff]  ;;  %vm626_vm4 = vcmp.lt.s32.totalorder %v621_v51, %v625_v53 }
  0x93   : > { %1163 = vmatprep.subr.bf16.mxu1 %v1162_v15  ;;  %1195 = vmatprep.subr.bf16.mxu0 %v1162_v15  ;;  %v1174_v41 = vpack.c.bf16 %v296_v40, %v293_v38  ;;  %v1178_v44 = vpack.c.bf16 %v302_v43, %v299_v42  ;;  %v305_v45 = vld [vmem:[#allocation6 + $0xa0] sm:$0xff]  ;;  %v308_v46 = vld [vmem:[#allocation6 + $0xb8] sm:$0xff]  ;;  %vm627_vm5 = vmand %vm623_vm3, %vm626_vm4 }
  0x94   : > { %v1182_v47 = vpack.c.bf16 %v308_v46, %v305_v45  ;;  %v715_v4 = vld [vmem:[#allocation7] sm:$0xff]  ;;  %v716_v5 = vld [vmem:[#allocation7 + $0x10] sm:$0xff]  ;;  %v799_v18 = vld [vmem:[#allocation7 + $0x98] sm:$0xff] }
  0x95   : > { %v1210_v7 = vpack.c.bf16 %v716_v5, %v715_v4  ;;  %v717_v9 = vld [vmem:[#allocation7 + $0x20] sm:$0xff]  ;;  %v718_v10 = vld [vmem:[#allocation7 + $0x30] sm:$0xff]  ;;  %v801_v19 = vld [vmem:[#allocation7 + $0xa8] sm:$0xff] }
  0x96   : > { %1165 = vmatpush1.bf16.msra.mxu1 %v1164_v20  ;;  %1197 = vmatpush1.bf16.msra.mxu0 %v1164_v20  ;;  %v1213_v11 = vpack.c.bf16 %v718_v10, %v717_v9  ;;  %v719_v12 = vld [vmem:[#allocation7 + $0x40] sm:$0xff]  ;;  %v720_v13 = vld [vmem:[#allocation7 + $0x50] sm:$0xff]  ;;  %v803_v22 = vld [vmem:[#allocation7 + $0xb8] sm:$0xff]  ;;  %v835_v10 = vsub.s32 0, %v1769_v49 }
  0x97   : > { %1167 = vmatprep.subr.bf16.mxu1 %v1166_v21  ;;  %1199 = vmatprep.subr.bf16.mxu0 %v1166_v21  ;;  %v1216_v14 = vpack.c.bf16 %v720_v13, %v719_v12  ;;  %v721_v15 = vld [vmem:[#allocation7 + $0x60] sm:$0xff]  ;;  %v722_v16 = vld [vmem:[#allocation7 + $0x70] sm:$0xff]  ;;  %v1221_v21 = vpack.c.bf16 %v801_v19, %v799_v18  ;;  %v805_v23 = vld [vmem:[#allocation7 + $0xc8] sm:$0xff]  ;;  %v839_v12 = vsub.s32 1, %v1769_v49 }
  0x98   : > { %v1219_v17 = vpack.c.bf16 %v722_v16, %v721_v15  ;;  %v798_v20 = vld [vmem:[#allocation7 + $0x90] sm:$0xff]  ;;  %v815_v40 = vld [vmem:[#allocation7 + $0x118] sm:$0xff]  ;;  %v816_v45 = vld [vmem:[#allocation7 + $0x120] sm:$0xff] }
  0x99   : > { %v810_v38 = vld [vmem:[#allocation7 + $0xf0] sm:$0xff]  ;;  %v819_v50 = vld [vmem:[#allocation7 + $0x138] sm:$0xff]  ;;  %v821_v51 = vld [vmem:[#allocation7 + $0x148] sm:$0xff] }
  0x9a   : > { %1169 = vmatpush1.bf16.msra.mxu1 %v1168_v24  ;;  %1201 = vmatpush1.bf16.msra.mxu0 %v1168_v24  ;;  %v1241_v52 = vpack.c.bf16 %v821_v51, %v819_v50  ;;  %v818_v53 = vld [vmem:[#allocation7 + $0x130] sm:$0xff]  ;;  %v723_v5 = vld [vmem:[#allocation7 + $0x80] ss:$0 sm:$0xff] }
  0x9b   : > { %1202 = vmatprep.subr.bf16.mxu0 %v1512_v28  ;;  %1171 = vmatprep.subr.bf16.mxu1 %v1170_v39  ;;  %v917_v19 = vld [vmem:[#allocation7 + $0x1a0] ss:$8 sm:$0x3] }
  0x9d   : > { %1064 = vmatmul.mubr.msk.f32.vlgmr.msra.gmra.mrb[0].mxu1 %vm309_vm0, %v283_v25  ;;  %1068 = vmatmul.mubr.msk.f32.vlgmr.msra.gmra.mrb[0].mxu0 %vm309_vm0, %v282_v26  ;;  %v802_v26 = vld [vmem:[#allocation7 + $0xb0] sm:$0xff] }
  0x9e   : > { %385 = vmatprep.mubr.f32.mxu1 %v1511_v0  ;;  %1125 = vmatprep.mubr.msk.f32.mxu0 %vm1513_vm1, %v1511_v0 }
  0x9f   : > { %1173 = vmatpush3.bf16.msra.mxu1 %v1170_v39  ;;  %v812_v39 = vld [vmem:[#allocation7 + $0x100] sm:$0xff] }
  0xa0   : > { %1175 = vmatprep.subr.bf16.mxu1 %v1174_v41  ;;  %v1235_v42 = vpack.c.bf16 %v812_v39, %v810_v38 }
  0xa1   : > { %1065 = vmatmul.mubr.msk.f32.gmra.mrb[2].mxu1 %vm309_vm0, %v284_v27 }
  0xa2   : > { %1118 = vmatprep.mubr.msk.f32.mxu1 %vm309_vm0, %v283_v25  ;;  %v1225_v25 = vpack.c.bf16 %v805_v23, %v803_v22 }
  0xa3   : > { %1177 = vmatpush3.bf16.msra.mxu1 %v1174_v41  ;;  %v817_v41 = vld [vmem:[#allocation7 + $0x128] sm:$0xff] }
  0xa4   : > { %1179 = vmatprep.subr.bf16.mxu1 %v1178_v44  ;;  %v1237_v43 = vpack.c.bf16 %v817_v41, %v815_v40 }
  0xa7   : > { %1181 = vmatpush3.bf16.msra.mxu1 %v1178_v44  ;;  %v814_v44 = vld [vmem:[#allocation7 + $0x110] sm:$0xff] }
  0xa8   : > { %1183 = vmatprep.subr.bf16.mxu1 %v1182_v47  ;;  %v1239_v46 = vpack.c.bf16 %v816_v45, %v814_v44 }
  0xab   : > { %1185 = vmatpush3.bf16.msra.mxu1 %v1182_v47 }
  0xac   : > { %1206 = vmatprep.subr.bf16.mxu1 %v1512_v28 }
  0xae   : > { %1119 = vmatmul.mubr.msk.f32.vlgmr.msra.gmra.mrb[4].mxu1 %vm309_vm0, %v284_v27  ;;  %v804_v27 = vld [vmem:[#allocation7 + $0xc0] sm:$0xff] }
  0xaf   : > { %1132 = vmatprep.mubr.msk.f32.mxu1 %vm1513_vm1, %v1511_v0 }
 0x170   : > { %v382_v29 = vpop.f32.mrb[0].mxu1  ;;  %v535_v30 = vpop.f32.mrb[0].mxu0 }
 0x171   : > { %v383_v31 = vpop.f32.mrb[1].mxu1  ;;  %v537_v32 = vpop.f32.mrb[1].mxu0  ;;  %v807_v29 = vld [vmem:[#allocation7 + $0xd8] sm:$0xff] }
 0x174   : > { %v387_v33 = vpop.f32.mrb[2].mxu1 }
 0x175   : > { %v388_v34 = vpop.f32.mrb[3].mxu1  ;;  %v808_v33 = vld [vmem:[#allocation7 + $0xe0] sm:$0xff] }
 0x176   : > { %v1203_v35 = vpack.c.bf16 %v388_v34, %v383_v31  ;;  %v1227_v31 = vpack.c.bf16 %v804_v27, %v802_v26  ;;  %v811_v34 = vld [vmem:[#allocation7 + $0xf8] sm:$0xff]  ;;  %v918_v27 = vld [vmem:[#allocation7 + $0x1b0] ss:$0 sm:$0xff] }
 0x178   : > { %1205 = vmatpush3.bf16.xpose.msk.msra.mxu0 %vm1204_vm2, %v1203_v35  ;;  %v813_v35 = vld [vmem:[#allocation7 + $0x108] sm:$0xff] }
 0x179   : > { %1222 = vmatprep.subr.bf16.mxu0 %v1221_v21  ;;  %v1233_v37 = vpack.c.bf16 %v813_v35, %v811_v34  ;;  %v927_v21 = vrot.slane %v917_v19, %v839_v12 }
 0x17f   : > { %1126 = vmatmul.mubr.msk.f32.vlgmr.msra.gmra.mrb[2].mxu0 %vm309_vm0, %v535_v30  ;;  %v809_v30 = vld [vmem:[#allocation7 + $0xe8] sm:$0xff] }
 0x180   : > { %907 = vmatprep.mubr.f32.mxu0 %v1511_v0  ;;  %v1229_v32 = vpack.c.bf16 %v809_v30, %v807_v29 }
 0x181   : > { %v1120_v63 = vpop.f32.mrb[4].mxu1 }
 0x182   : > { %v457_v1 = vpop.f32.mrb[5].mxu1 }
 0x183   : > { %v1207_v2 = vpack.c.bf16 %v1120_v63, %v457_v1 }
 0x185   : > { %1208 = vmatpush3.bf16.msra.mxu1 %v1207_v2  ;;  %v826_v2 = vld [vmem:[#allocation7 + $0x170] sm:$0xff] }
 0x186   : > { %1209 = vmatprep.subr.bf16.mxu1 %v1512_v28 }
 0x252   : > { %v614_v54 = vpop.f32.mrb[2].mxu0 }
 0x253   : > { %v628_v55 = vsel %vm627_vm5, %v614_v54, -1e+30  ;;  %v1127_v56 = vpop.f32.mrb[3].mxu0  ;;  %v820_v54 = vld [vmem:[#allocation7 + $0x140] sm:$0xff] }
 0x254   : > { %v630_v57 = vsel %vm629_vm6, %v628_v55, -inf  ;;  %v823_v56 = vld [vmem:[#allocation7 + $0x158] sm:$0xff] }
 0x255   : > { %631 = vmax.xlane.f32.xlu0 %v630_v57  ;;  %v825_v57 = vld [vmem:[#allocation7 + $0x168] sm:$0xff] }
 0x2e2   : > { %v632_v58 = vpop.xlane.xlu0 %631 }
 0x2e3   : > { %v633_v59 = vsub.f32 %v628_v55, %v632_v58  ;;  %v1243_v55 = vpack.c.bf16 %v820_v54, %v818_v53  ;;  %v822_v58 = vld [vmem:[#allocation7 + $0x150] sm:$0xff] }
 0x2e5   : > { %v634_v60 = vmul.f32 1.442695, %v633_v59  ;;  %v1245_v59 = vpack.c.bf16 %v825_v57, %v823_v56 }
 0x2e7   : > { %1327 = vpow2.f32 %v634_v60  ;;  %v824_v60 = vld [vmem:[#allocation7 + $0x160] sm:$0xff] }
 0x2e8   : > { %v1247_v63 = vpack.c.bf16 %v824_v60, %v822_v58 }
 0x2f1   : > { %v1328_v61 = vpop.eup %1327 }
 0x2f2   : > { %v636_v62 = vsel %vm629_vm6, %v1328_v61, 0.0 }
 0x2f3   : > { %637 = vadd.xlane.f32.xlu0 %v636_v62  ;;  %v829_v62 = vld [vmem:[#allocation7 + $0x188] sm:$0xff] }
 0x380   : > { %v638_v3 = vpop.xlane.xlu0 %637 }
 0x381   : > { %1329 = vrcp.f32 %v638_v3  ;;  %v828_v3 = vld [vmem:[#allocation7 + $0x180] sm:$0xff] }
 0x382   : > { %v1251_v4 = vpack.c.bf16 %v828_v3, %v826_v2 }
 0x38b   : > { %v1330_v6 = vpop.eup %1329 }
 0x38c   : > { %v640_v8 = vmul.f32 %v1330_v6, %v1328_v61  ;;  %v827_v61 = vld [vmem:[#allocation7 + $0x178] sm:$0xff] }
 0x38d   : > { %v1249_v1 = vpack.c.bf16 %v829_v62, %v827_v61 }
 0x38e   : > { %1133 = vmatmul.mubr.msk.f32.vlgmr.msra.gmra.mrb[6].mxu1 %vm641_vm7, %v640_v8 }
 0x38f   : > { %1211 = vmatpush3.bf16.msra.mxu1 %v1210_v7  ;;  %1151 = vmatprep.mubr.msk.f32.mxu1 %vm1513_vm1, %v1511_v0  ;;  %v800_v0 = vld [vmem:[#allocation7 + $0xa0] sm:$0xff] }
 0x390   : > { %1212 = vmatprep.subr.bf16.mxu1 %v1512_v28  ;;  %v1223_v24 = vpack.c.bf16 %v800_v0, %v798_v20  ;;  %v923_v20 = vrot.slane %v917_v19, %v835_v10 }
 0x392   : > { %1224 = vmatpush1.bf16.msra.mxu0 %v1223_v24 }
 0x393   : > { %1214 = vmatpush3.bf16.msra.mxu1 %v1213_v11  ;;  %1226 = vmatprep.subr.bf16.mxu0 %v1225_v25  ;;  %v831_v11 = vld [vmem:[#allocation7 + $0x190] ss:$8 sm:$0x3] }
 0x394   : > { %1215 = vmatprep.subr.bf16.mxu1 %v1512_v28  ;;  %v836_v13 = vrot.slane %v831_v11, %v835_v10 }
 0x396   : > { %1228 = vmatpush1.bf16.msra.mxu0 %v1227_v31 }
 0x397   : > { %1217 = vmatpush3.bf16.msra.mxu1 %v1216_v14  ;;  %1230 = vmatprep.subr.bf16.mxu0 %v1229_v32  ;;  %v840_v14 = vrot.slane %v831_v11, %v839_v12 }
 0x398   : > { %1218 = vmatprep.subr.bf16.mxu1 %v1512_v28  ;;  %v806_v28 = vld [vmem:[#allocation7 + $0xd0] sm:$0xff] }
 0x399   : > { %v1231_v36 = vpack.c.bf16 %v808_v33, %v806_v28 }
 0x39b   : > { %1220 = vmatpush3.bf16.msra.mxu1 %v1219_v17  ;;  %1232 = vmatpush1.bf16.msra.mxu0 %v1231_v36 }
 0x39c   : > { %1234 = vmatprep.subr.bf16.mxu0 %v1233_v37 }
 0x39f   : > { %1236 = vmatpush1.bf16.msra.mxu0 %v1235_v42 }
 0x3a0   : > { %1238 = vmatprep.subr.bf16.mxu0 %v1237_v43 }
 0x3a3   : > { %1240 = vmatpush1.bf16.msra.mxu0 %v1239_v46 }
 0x3a4   : > { %1242 = vmatprep.subr.bf16.mxu0 %v1241_v52 }
 0x3a7   : > { %1244 = vmatpush1.bf16.msra.mxu0 %v1243_v55 }
 0x3a8   : > { %1246 = vmatprep.subr.bf16.mxu0 %v1245_v59 }
 0x3ab   : > { %1248 = vmatpush1.bf16.msra.mxu0 %v1247_v63 }
 0x3ac   : > { %1250 = vmatprep.subr.bf16.mxu0 %v1249_v1 }
 0x3af   : > { %1252 = vmatpush1.bf16.msra.mxu0 %v1251_v4 }
 0x461   : > { %v711_v47 = vpop.f32.mrb[6].mxu1 }
 0x462   : > { %v1134_v48 = vpop.f32.mrb[7].mxu1  ;;  %1152 = vmatmul.mubr.msk.f32.vlgmr.msra.gmra.mrb[8].mxu1 %vm309_vm0, %v711_v47 }
 0x535   : > { %v793_v6 = vpop.f32.mrb[8].mxu1 }
 0x536   : > { %v794_v7 = vadd.f32 %v793_v6, %v723_v5  ;;  %v1153_v8 = vpop.f32.mrb[9].mxu1 }
 0x538   : > { %1331 = vtanh.f32 %v794_v7 }
 0x542   : > { %v1332_v9 = vpop.eup %1331 }
 0x543   : > { %908 = vmatmul.mubr.f32.vlgmr.msra.gmra.mrb[4].mxu0 %v1332_v9 }
 0x616   : > { %v909_v15 = vpop.f32.mrb[4].mxu0 }
 0x617   : > { %v910_v16 = vadd.f32 %v909_v15, %v836_v13  ;;  %v911_v17 = vpop.f32.mrb[5].mxu0 }
 0x618   : > { %v912_v18 = vadd.f32 %v911_v17, %v840_v14 }
 0x619   : > { %1333 = vtanh.f32 %v910_v16 }
 0x61a   : > { %1335 = vtanh.f32 %v912_v18 }
 0x623   : > { %v1334_v0 = vpop.eup %1333 }
 0x624   : > { %v1336_v22 = vpop.eup %1335  ;;  %v930_v23 = vmul.f32 %v1334_v0, %v923_v20 }
 0x625   : > { %v931_v24 = vmul.f32 %v1336_v22, %v927_v21 }
 0x626   : > { %v933_v25 = vsel %vm932_vm8, %v930_v23, 0.0 }
 0x627   : > { %v934_v49 = vsel %vm932_vm8, %v931_v24, 0.0 }
 0x628   : > { %v935_v26 = vadd.f32 %v934_v49, %v933_v25 }
 0x62a   : > { %936 = vadd.xlane.f32.xlu1 %v935_v26 }
 0x6b7   : > { %v937_v29 = vpop.xlane.xlu1 %936 }
 0x6b8   : > { %v938_v30 = vadd.f32 %v937_v29, %v918_v27 }
 0x6ba   : > { %940 = vst.msk [vmem:[%s281_s14] sm:$0x3] %vm939_vm9, %v938_v30 }
 0x6bb PF: > { %p18_p12 = scmp.ge.s32.totalorder %s1632_s7, 10   ;;  %s1818_s15 = smov %s1491_s16 }
 0x6bc   : > { %s1819_s16 = smov %s1495_s17  ;;  %s1820_s17 = smov %s1641_s10 }
 0x6bd   : > { %s1821_s18 = smov %s1632_s7  ;;  %20 = sbr.rel (!%p18_p12) target bundleno = 6 (0x6), region = 99 }
 0x6c4   :  { %960 = vsyncpa [#allocation3], 1 }
 0x6c5   :  { %962 = vsyncpa [#allocation3 + $0x1], 1 }
 0x6c6   :  { %963 = vsyncpa [#allocation5], 1 }
 0x6c7   :  { %965 = vsyncpa [#allocation5 + $0x1], 1 }
 0x6c8   :  { %966 = vsyncpa [#allocation8], 1 }

</bundles_post_ra>
